<compile_context>
chip_gen: v7x
topology: tpu7x:2x2x1
jax: 0.10.0
libtpu: 0.0.40
codegen_flags: <defaults>
</compile_context>

<pallas_src>
import functools

import jax
import jax.numpy as jnp
from jax.experimental import pallas as pl
from jax.experimental.pallas import tpu as pltpu


def _avg_pool_window_kernel(p_ref, x_ref, o_ref):
    # p_ref: (out_len, S)   f32 pooling matrix (resident, block index constant)
    # x_ref: (1, S, D_TILE) one batch element, one feature tile
    # o_ref: (1, out_len, D_TILE)
    p = p_ref[...]
    x = x_ref[0].astype(jnp.float32)  # f32 accumulation path (also fixes bf16 inputs)
    out = jnp.dot(
        p,
        x,
        precision=jax.lax.Precision.HIGHEST,
        preferred_element_type=jnp.float32,
    )
    o_ref[0] = out.astype(o_ref.dtype)


def _pick_d_tile(S, D, out_len, itemsize, budget_bytes=24 << 20):
    """Largest lane-aligned D tile that divides D and keeps double-buffered VMEM
    under ~24 MiB (safe for v7x's 32 MiB scoped default / 64 MiB physical)."""
    if D % 128 != 0:
        return D  # full-extent fallback (block dim == array dim is always legal)
    p_bytes = out_len * S * 4
    candidates = [c for c in range(128, D + 1, 128) if D % c == 0]
    fitting = [
        c
        for c in candidates
        if 2 * S * c * itemsize + 2 * out_len * c * itemsize + p_bytes <= budget_bytes
    ]
    return max(fitting) if fitting else 128


def average_pooling_window(x, window: int, stride: int):
    """x: (B, S, D) -> (B, (S - window)//stride + 1, D), mean over each window."""
    B, S, D = x.shape
    out_len = (S - window) // stride + 1

    # Static pooling matrix: P[i, j] = 1/window  if  i*stride <= j < i*stride + window.
    row_start = (jnp.arange(out_len, dtype=jnp.int32) * stride)[:, None]  # (out_len, 1)
    col = jnp.arange(S, dtype=jnp.int32)[None, :]                         # (1, S)
    pool_matrix = (
        ((col >= row_start) & (col < row_start + window)).astype(jnp.float32)
        * jnp.float32(1.0 / window)
    )  # (out_len, S)

    d_tile = _pick_d_tile(S, D, out_len, jnp.dtype(x.dtype).itemsize)
    n_d_tiles = D // d_tile

    return pl.pallas_call(
        _avg_pool_window_kernel,
        out_shape=jax.ShapeDtypeStruct((B, out_len, D), x.dtype),
        grid_spec=pltpu.PrefetchScalarGridSpec(
            num_scalar_prefetch=0,
            grid=(B, n_d_tiles),
            in_specs=[
                # Pooling matrix: full array, block index constant -> fetched once.
                pl.BlockSpec((out_len, S), lambda b, d: (0, 0)),
                # Input: one batch element, one feature tile.
                pl.BlockSpec((1, S, d_tile), lambda b, d: (b, 0, d)),
            ],
            out_specs=pl.BlockSpec((1, out_len, d_tile), lambda b, d: (b, 0, d)),
        ),
        compiler_params=pltpu.CompilerParams(
            dimension_semantics=("parallel", "parallel"),
        ),
    )(pool_matrix, x)


def _reference(x, window, stride):
    outs = []
    S = x.shape[1]
    for i in range(0, S - window + 1, stride):
        outs.append(jnp.mean(x[:, i : i + window, :], axis=1))
    return jnp.stack(outs, axis=1)


if __name__ == "__main__":
    window, stride = 4, 2
    B, S, D = 2, 16, 128  # D lane-aligned to 128 -> dense (unmasked) output stores
    key = jax.random.PRNGKey(0)
    x = jax.random.normal(key, (B, S, D), dtype=jnp.float32)

    out = average_pooling_window(x, window, stride)
    out = jax.block_until_ready(out)

    ref = _reference(x, window, stride)
    assert out.shape == ref.shape, (out.shape, ref.shape)
    assert jnp.allclose(out, ref, atol=1e-5, rtol=1e-5), "mismatch vs reference"

    print("KERNEL_OK")
</pallas_src>

<mosaic_0001>
module attributes {stable_mosaic.version = 11 : i64} {
  func.func @_avg_pool_window_kernel(%arg0: i32, %arg1: i32, %arg2: memref<7x16xf32, #tpu.memory_space<vmem>>, %arg3: memref<1x16x128xf32, #tpu.memory_space<vmem>>, %arg4: memref<1x7x128xf32, #tpu.memory_space<vmem>>) attributes {dimension_semantics = [#tpu.dimension_semantics<parallel>, #tpu.dimension_semantics<parallel>], iteration_bounds = array<i64: 2, 1>, scalar_prefetch = 0 : i64, scratch_operands = 0 : i64, tpu.core_type = #tpu.core_type<tc>, window_params = [{pipeline_mode = #tpu.pipeline_mode<synchronous>, transform_indices = @transform_0, window_bounds = array<i64: 7, 16>}, {transform_indices = @transform_1, window_bounds = array<i64: 1, 16, 128>}, {transform_indices = @transform_2, window_bounds = array<i64: 1, 7, 128>}]} {
    %c0 = arith.constant 0 : index
    %c0_0 = arith.constant 0 : index
    %0 = vector.load %arg2[%c0, %c0_0] : memref<7x16xf32, #tpu.memory_space<vmem>>, vector<7x16xf32>
    %c0_1 = arith.constant 0 : index
    %c0_2 = arith.constant 0 : index
    %c0_3 = arith.constant 0 : index
    %1 = vector.load %arg3[%c0_1, %c0_2, %c0_3] : memref<1x16x128xf32, #tpu.memory_space<vmem>>, vector<1x16x128xf32>
    %2 = vector.shape_cast %1 : vector<1x16x128xf32> to vector<16x128xf32>
    %cst = arith.constant dense<0.000000e+00> : vector<7x128xf32>
    %3 = tpu.matmul %0, %2, %cst {dimension_numbers = #tpu.dot_dimension_numbers<[1], [0], [0], [1], [0, 0, 1, 1], [], []>, precision = #tpu.contract_precision<fp32>} : vector<7x16xf32>, vector<16x128xf32>, vector<7x128xf32> -> vector<7x128xf32>
    %c0_4 = arith.constant 0 : index
    %c0_5 = arith.constant 0 : index
    %c0_6 = arith.constant 0 : index
    %4 = vector.load %arg4[%c0_4, %c0_5, %c0_6] : memref<1x7x128xf32, #tpu.memory_space<vmem>>, vector<1x7x128xf32>
    %5 = vector.shape_cast %4 : vector<1x7x128xf32> to vector<7x128xf32>
    %6 = vector.shape_cast %3 : vector<7x128xf32> to vector<1x7x128xf32>
    tpu.vector_store %arg4[%c0_4, %c0_5, %c0_6], %6 {strides = array<i32>} : memref<1x7x128xf32, #tpu.memory_space<vmem>>, vector<1x7x128xf32>,
    return
  }
  func.func @transform_0(%arg0: i32, %arg1: i32) -> (i32, i32) {
    %c0_i32 = arith.constant 0 : i32
    %c0_i32_0 = arith.constant 0 : i32
    %c0_i32_1 = arith.constant 0 : i32
    return %c0_i32, %c0_i32_0 : i32, i32
  }
  func.func @transform_1(%arg0: i32, %arg1: i32) -> (i32, i32, i32) {
    %c0_i32 = arith.constant 0 : i32
    %c0_i32_0 = arith.constant 0 : i32
    return %arg0, %c0_i32, %arg1 : i32, i32, i32
  }
  func.func @transform_2(%arg0: i32, %arg1: i32) -> (i32, i32, i32) {
    %c0_i32 = arith.constant 0 : i32
    %c0_i32_0 = arith.constant 0 : i32
    return %arg0, %c0_i32, %arg1 : i32, i32, i32
  }
}

</mosaic_0001>

<bundles_post_ra>
// kernel: tpu_custom_call.1
= control target key start
LH: loop header
LB: loop body
LE: loop exit
PB: predicated region body
PF: predicated region fallthrough
CT: control target
= control target key end

     0   :  { %7 = vsyncpa [#allocation3], 0  ;;  %s1247_s0 = inlined_call_operand.hbm [shape: f32[7,16], index: 0, kind: input, shape index: {}]   ;;  %s1248_s1 = inlined_call_operand.hbm [shape: f32[2,16,128], index: 1, kind: input, shape index: {}]   ;;  %s1249_s2 = inlined_call_operand.vmem [shape: f32[2,7,128], index: 2, kind: output, shape index: {}]  }
   0x1   :  { %8 = vsyncpa [#allocation5], 0 }
   0x2   :  { %10 = vsyncpa [#allocation5 + $0x1], 0  ;;  %s1071_s9 = smov 0   ;;  %s1073_s10 = smov 0  }
   0x3   :  { %s1075_s11 = smov 0   ;;  %s1077_s12 = smov 0  }
   0x4   :  { %s1079_s13 = smov 0   ;;  %s1081_s14 = smov 0  }
   0x5 LB: > { %s762_s15 = sadd.s32 4294967295, %s1047_s14   ;;  %s58_s16 = sadd.s32 1, %s1035_s11  ;;  %s1047_s14 = sphi %s1081_s14, %s16_s14   ;;  %s1043_s13 = sphi %s1079_s13, %s1269_s13   ;;  %s1039_s12 = sphi %s1077_s12, %s1268_s12   ;;  %s1035_s11 = sphi %s1075_s11, %s1267_s11   ;;  %s1031_s10 = sphi %s1073_s10, %s1266_s10   ;;  %s1027_s9 = sphi %s1071_s9, %s1265_s9  }
   0x6   : > { %p65_p0 = scmp.ne.s32.totalorder %s1035_s11, %s1031_s10  ;;  %p66_p1 = scmp.eq.s32.totalorder %s1047_s14, 0 }
   0x7   : > { %p71_p2 = scmp.ne.s32.totalorder %s1031_s10, %s1027_s9  ;;  %p1105_p3 = scmp.eq.s32.totalorder %s762_s15, 0 }
   0x8   : > { %p67_p4 = por %p66_p1, %p65_p0  ;;  %p764_p5 = scmp.ge.s32.totalorder %s1047_s14, 1 }
   0x9   : > { %s1255_s17 = scalar_select %p1105_p3, 1, 0 }
   0xa   : > { %p1112_p6 = por %p1105_p3, %p71_p2  ;;  %p110_p7 = scmp.lt.s32.totalorder %s1047_s14, 3 }
   0xb   : > { %s1049_s20 = smov [#allocation2]   ;;  %p879_p10 = scmp.lt.s32.totalorder %s1047_s14, 2 }
   0xc   : > { %s1256_s18 = scalar_select %p1112_p6, 1, 0 }
   0xd   : > { %p1117_p8 = pnand %p764_p5, %p110_p7  ;;  %s123_s21 = sshll.u32 %s1049_s20, 4  ;;  %s124_s21 = int_to_ptr.vmem [resolvable:$true] %s123_s21 }
   0xe   : > { %s134_s22 = sand.u32 1, %s1035_s11   ;;  %p1131_p12 = pnand %p879_p10, %p67_p4 }
   0xf   : > { %s1257_s19 = scalar_select %p1117_p8, 1, 0 }
  0x10   : > { %p870_p9 = pneg %p1117_p8  ;;  %s935_s27 = scalar_lea.hbm %s1247_s0, 128 }
  0x11   : > { %s1259_s24 = scalar_select %p1131_p12, 1, 0 }
  0x12   : > { %p1127_p11 = pnand %p870_p9, %p1105_p3  ;;  %p936_p13 = scmp.ne.s32.totalorder %s1247_s0, %s935_s27 }
  0x13   : > { %p942_p5 = scmp.lt.u32.totalorder %s935_s27, %s1247_s0 }
  0x14   : > { %p937_p0 = pneg %p1127_p11 }
  0x16   : > { %p938_p1 = pnand %p937_p0, %p936_p13 }
  0x18   : > { %p939_p2 = pneg %p938_p1 }
  0x1a   : > { %p944_p4 = pnand %p942_p5, %p939_p2 }
  0x1c   : > { %947 = shalt.err (!%p944_p4)
}
  0x1d   : > { %s948_s4 = scalar_lea.vmem %s124_s21, 128  ;;  %p956_p6 = scmp.lt.s32.totalorder %s124_s21, %s124_s21 }
  0x1e   : > { %p949_p7 = scmp.ne.s32.totalorder %s124_s21, %s948_s4  ;;  %p957_p3 = scmp.lt.s32.totalorder %s948_s4, %s948_s4 }
  0x20   : > { %p951_p9 = pnand %p949_p7, %p937_p0  ;;  %p958_p8 = por %p957_p3, %p956_p6 }
  0x22   : > { %p952_p10 = pneg %p951_p9 }
  0x24   : > { %p959_p12 = pnand %p958_p8, %p952_p10 }
  0x26   : > { %962 = shalt.err (!%p959_p12)
}
  0x27   : > { %873 = dma.hbm_to_vmem [thread:$0]  (!%p1127_p11), %s1247_s0, 128, %s124_s21, [#allocation3]  }
  0x28   : > { %s28_s7 = sadd.s32 1, %s1043_s13  ;;  %s767_s8 = sshll.u32 %s134_s22, 4 }
  0x29   : > { %p30_p13 = scmp.ge.s32.totalorder %s28_s7, 2  ;;  %s776_s9 = sshll.u32 %s1043_s13, 8 }
  0x2a   : > { %s138_s15 = scalar_lea.vmem [#allocation4], %s767_s8  ;;  %s1160_s26 = scalar_lea.hbm %s1248_s1, %s776_s9 }
  0x2b   : > { %s146_s20 = sshll.u32 %s138_s15, 4  ;;  %s1271_s7 = smov (%p30_p13, %s28_s7), 0  ;;  %s1162_s20 = int_to_ptr.vmem [resolvable:$true] %s146_s20 }
  0x2c   : > { %s53_s21 = ssub.s32 %s1043_s13, %s1271_s7  ;;  %s1172_s28 = scalar_lea.sflag [#allocation5], %s134_s22 }
  0x2d   : > { %p1166_p3 = scmp.eq.s32.totalorder %s53_s21, 0  ;;  %s963_s29 = scalar_lea.hbm %s1160_s26, 256 }
  0x2e   : > { %p964_p6 = scmp.ne.s32.totalorder %s1160_s26, %s963_s29  ;;  %p1261_p8 = scmp.ne.s32.totalorder %s1259_s24, 0 }
  0x2f   : > { %s968_s4 = scalar_lea.hbm %s1248_s1, 512  ;;  %p969_p1 = scmp.lt.u32.totalorder %s1160_s26, %s1248_s1 }
  0x30   : > { %p965_p11 = pneg %p1261_p8  ;;  %p970_p2 = scmp.lt.u32.totalorder %s968_s4, %s963_s29 }
  0x31   : > { %p972_p4 = scmp.lt.u32.totalorder %s963_s29, %s1160_s26 }
  0x32   : > { %p966_p12 = pnand %p965_p11, %p964_p6  ;;  %p971_p5 = por %p970_p2, %p969_p1 }
  0x34   : > { %p967_p0 = pneg %p966_p12  ;;  %p973_p7 = por %p972_p4, %p971_p5 }
  0x36   : > { %p974_p9 = pnand %p973_p7, %p967_p0 }
  0x38   : > { %977 = shalt.err (!%p974_p9)
}
  0x39   : > { %s978_s22 = scalar_lea.vmem %s1162_s20, 256  ;;  %s1050_s8 = smov [#allocation4]  }
  0x3a   : > { %p979_p10 = scmp.ne.s32.totalorder %s1162_s20, %s978_s22  ;;  %s983_s9 = sshll.u32 %s1050_s8, 4  ;;  %s984_s9 = int_to_ptr.vmem [resolvable:$false] %s983_s9 }
  0x3b   : > { %s985_s15 = scalar_lea.vmem %s984_s9, 512  ;;  %p986_p12 = scmp.lt.s32.totalorder %s1162_s20, %s984_s9 }
  0x3c   : > { %p981_p13 = pnand %p979_p10, %p965_p11  ;;  %p987_p1 = scmp.lt.s32.totalorder %s985_s15, %s978_s22 }
  0x3e   : > { %p982_p6 = pneg %p981_p13  ;;  %p988_p2 = por %p987_p1, %p986_p12 }
  0x40   : > { %p989_p5 = pnand %p988_p2, %p982_p6 }
  0x42   : > { %992 = shalt.err (!%p989_p5)
}
  0x43   : > { %s1051_s23 = smov 128   ;;  %s1052_s25 = smov 8  }
  0x44   : > { %877 = dma.hbm_to_vmem [thread:$0]  (!%p1261_p8), %s1160_s26, 256, %s1162_s20, %s1172_s28, %s1051_s23, %s1051_s23, %s1052_s25  }
  0x45   : > { %s1205_s21 = scalar_select %p1166_p3, %s1035_s11, %s58_s16  }
  0x46   : > { %p1262_p11 = scmp.ne.s32.totalorder %s1257_s19, 0 }
  0x47   : > { %p1263_p0 = scmp.ne.s32.totalorder (!%p1262_p11), %s1255_s17, 0 }
  0x48   : > { %158 = sbr.rel (%p1262_p11) target bundleno = 329 (0x149), region = 28 }
  0x4f   : > { %1018 = dma.done.wait (%p1263_p0), [#allocation3], 128  }
  0x50   : > { %1020 = vsyncadd (%p1263_p0), [#allocation3], 4294967168  ;;  %s164_s29 = sand.u32 1, %s1031_s10   ;;  %p1264_p8 = scmp.ne.s32.totalorder %s1256_s18, 0 }
  0x51   : > { %s772_s30 = sshll.u32 %s164_s29, 4  ;;  %s165_s3 = scalar_lea.sflag [#allocation5], %s164_s29 }
  0x52   : > { %s168_s24 = scalar_lea.vmem [#allocation4], %s772_s30 }
  0x53   : > { %1022 = dma.done.wait (%p1264_p8), %s165_s3, 256  }
  0x54   : > { %1024 = vsyncadd (%p1264_p8), %s165_s3, 4294967040  ;;  %v1053_v0 = vmov 0.0|0.0   ;;  %vm1054_vm0 = vmmov 0   ;;  %v1055_v1 = vmov 0.0   ;;  %vm201_vm1 = vcmask 130048   ;;  %v199_v2 = vld [vmem:[%s168_s24] sm:$0xff] }
  0x55   : > { %846 = vmatprep.subr.bf16.mxu0 %v1053_v0  ;;  %820 = vmatprep.mubr.msk.f32.mxu0 %vm1054_vm0, %v1055_v1  ;;  %v200_v3 = vld [vmem:[%s168_s24 + $0x8] sm:$0xff]  ;;  %v206_v5 = vand.u32 4294901760, %v199_v2  ;;  %p191_p3 = scmp.lt.s32.totalorder %s1039_s12, 1 }
  0x56   : > { %837 = vmatprep.subr.bf16.mxu1 %v1053_v0  ;;  %799 = vmatprep.mubr.msk.f32.mxu1 %vm1054_vm0, %v1055_v1  ;;  %v198_v4 = vld [vmem:[#allocation2] sm:$0x7f]  ;;  %v209_v6 = vand.u32 4294901760, %v200_v3 }
  0x57   : > { %v203_v7 = vsel %vm201_vm1, %v198_v4, 0  ;;  %v284_v10 = vsub.f32 %v199_v2, %v206_v5  ;;  %s1273_s12 = smov (!%p191_p3, %s1039_s12), 1 }
  0x58   : > { %v272_v8 = vand.u32 4294901760, %v203_v7  ;;  %v838_v9 = vpack.c.bf16 %v209_v6, %v206_v5  ;;  %v291_v11 = vsub.f32 %v200_v3, %v209_v6  ;;  %s773_s16 = sshll.u32 %s1273_s12, 3 }
  0x59   : > { %v285_v13 = vand.u32 4294901760, %v284_v10  ;;  %s197_s19 = scalar_lea.vmem %s1249_s2, %s773_s16 }
  0x5a   : > { %v273_v12 = vsub.f32 %v203_v7, %v272_v8  ;;  %848 = vmatpush3.bf16.msra.mxu0 %v838_v9  ;;  %839 = vmatpush3.bf16.msra.mxu1 %v838_v9  ;;  %v292_v14 = vand.u32 4294901760, %v291_v11  ;;  %v844_v24 = vpack.c.bf16 %v291_v11, %v284_v10 }
  0x5b   : > { %840 = vmatprep.subr.bf16.mxu1 %v1053_v0  ;;  %849 = vmatprep.subr.bf16.mxu0 %v1053_v0  ;;  %v286_v16 = vsub.f32 %v284_v10, %v285_v13 }
  0x5c   : > { %v274_v15 = vand.u32 4294901760, %v273_v12  ;;  %v293_v17 = vsub.f32 %v291_v11, %v292_v14  ;;  %v850_v18 = vpack.c.bf16 %v292_v14, %v285_v13 }
  0x5d   : > { %v287_v20 = vand.u32 4294901760, %v286_v16 }
  0x5e   : > { %821 = vmatmul.mubr.f32.vlgmr.msra.gmra.mrb[0].mxu0 %v274_v15  ;;  %v275_v19 = vsub.f32 %v273_v12, %v274_v15  ;;  %v294_v21 = vand.u32 4294901760, %v293_v17 }
  0x5f   : > { %851 = vmatpush3.bf16.msra.mxu0 %v850_v18  ;;  %827 = vmatprep.mubr.msk.f32.mxu0 %vm1054_vm0, %v1055_v1 }
  0x60   : > { %v276_v22 = vand.u32 4294901760, %v275_v19  ;;  %852 = vmatprep.subr.bf16.mxu0 %v1053_v0  ;;  %v841_v23 = vpack.c.bf16 %v294_v21, %v287_v20 }
  0x62   : > { %800 = vmatmul.mubr.f32.vlgmr.msra.gmra.mrb[0].mxu1 %v276_v22 }
  0x63   : > { %842 = vmatpush3.bf16.msra.mxu1 %v841_v23  ;;  %806 = vmatprep.mubr.msk.f32.mxu1 %vm1054_vm0, %v1055_v1 }
  0x64   : > { %843 = vmatprep.subr.bf16.mxu1 %v1053_v0 }
  0x66   : > { %828 = vmatmul.mubr.f32.vlgmr.msra.gmra.mrb[0].mxu0 %v272_v8 }
  0x67   : > { %854 = vmatpush3.bf16.msra.mxu0 %v838_v9  ;;  %834 = vmatprep.mubr.msk.f32.mxu0 %vm1054_vm0, %v1055_v1 }
  0x6a   : > { %807 = vmatmul.mubr.f32.vlgmr.msra.gmra.mrb[0].mxu1 %v272_v8 }
  0x6b   : > { %845 = vmatpush3.bf16.msra.mxu1 %v844_v24  ;;  %813 = vmatprep.mubr.msk.f32.mxu1 %vm1054_vm0, %v1055_v1 }
  0x6e   : > { %835 = vmatmul.mubr.f32.vlgmr.msra.gmra.mrb[0].mxu0 %v272_v8 }
  0x72   : > { %814 = vmatmul.mubr.f32.vlgmr.msra.gmra.mrb[0].mxu1 %v273_v12 }
 0x141   : > { %v660_v25 = vpop.f32.mrb[0].mxu0 }
 0x142   : > { %v836_v26 = vpop.f32.mrb[1].mxu0 }
 0x145   : > { %v435_v27 = vpop.f32.mrb[0].mxu1 }
 0x146   : > { %v855_v28 = vadd.f32 %v660_v25, %v435_v27  ;;  %v815_v29 = vpop.f32.mrb[1].mxu1 }
 0x148   : > { %664 = vst [vmem:[%s197_s19] sm:$0x7f] %v855_v28 }
 0x149 PF: > { %s16_s14 = sadd.s32 1, %s1047_s14   ;;  %s1265_s9 = smov %s1031_s10 }
 0x14a   : > { %p13_p4 = scmp.ge.s32.totalorder %s16_s14, 4   ;;  %s1266_s10 = smov %s1035_s11 }
 0x14b   : > { %s1267_s11 = smov %s1205_s21  ;;  %s1268_s12 = smov %s1043_s13 }
 0x14c   : > { %s1269_s13 = smov %s1271_s7  ;;  %15 = sbr.rel (!%p13_p4) target bundleno = 5 (0x5), region = 73 }
 0x153   :  { %690 = vsyncpa [#allocation3], 1 }
 0x154   :  { %692 = vsyncpa [#allocation3 + $0x1], 1 }
 0x155   :  { %693 = vsyncpa [#allocation5], 1 }
 0x156   :  { %695 = vsyncpa [#allocation5 + $0x1], 1 }

</bundles_post_ra>
